<compile_context>
chip_gen: v7x
topology: tpu7x:2x2x1
jax: 0.10.0
libtpu: 0.0.40
codegen_flags: <defaults>
</compile_context>

<pallas_src>
import functools

import jax
import jax.numpy as jnp
from jax.experimental import pallas as pl
from jax.experimental.pallas import tpu as pltpu


def _round_up(x, m):
    return ((x + m - 1) // m) * m


def _ctc_head_kernel(x_ref, w_ref, b_ref, out_ref, *, apply_softmax):
    """One row-tile per grid step.

    x_ref:   (tm, C)   flattened (B*T) sequence features, compute dtype (bf16)
    w_ref:   (C, Vp)   fc weight, (in, out) layout, lane-padded, compute dtype
    b_ref:   (1, Vp)   fc bias (f32); padded lanes hold -1e30
    out_ref: (tm, Vp)  softmax probabilities (padded lanes == 0) or raw logits
    """
    # Linear on the MXU: bf16 inputs, f32 accumulate.
    logits = jnp.dot(x_ref[...], w_ref[...],
                     preferred_element_type=jnp.float32) + b_ref[...]

    if apply_softmax:
        # Softmax over the vocab axis (dim=2 of the original (B, T, V) tensor).
        # Padded lanes carry logits of -1e30 -> exp() == 0 -> they do not
        # perturb the real-class distribution.
        m = jnp.max(logits, axis=-1, keepdims=True)
        e = jnp.exp(logits - m)
        denom = jnp.sum(e, axis=-1, keepdims=True)
        inv = pl.reciprocal(denom, approx=True)      # single EUP vrcp per row
        out = e * inv
    else:
        out = logits                                  # argmax-invariant path
    out_ref[...] = out.astype(out_ref.dtype)


def init_ctc_head_params(fc_w, fc_b, compute_dtype=jnp.bfloat16):
    """One-time padding/layout of the torch-Linear fc params.

    Call once at model init and reuse the result on every forward (hoists the
    transpose + scatter-init HBM passes out of the hot path).

    fc_w: (V, C) torch Linear weight (out, in); fc_b: (V,).
    """
    V, C = fc_w.shape
    Vp = _round_up(max(V, 128), 128)          # lane-dense vocab padding
    w_cv = jnp.zeros((C, Vp), compute_dtype).at[:, :V].set(
        jnp.asarray(fc_w, jnp.float32).T.astype(compute_dtype))
    # Bias stays f32 (added after the f32 MXU accumulate); padded lanes get a
    # large negative so softmax -> exactly 0 there.
    b_1v = jnp.full((1, Vp), -1e30, jnp.float32).at[0, :V].set(
        jnp.asarray(fc_b, jnp.float32))
    return {"w_cv": w_cv, "b_1v": b_1v, "V": V}


def _pick_row_tile(M, Vp, out_bytes):
    """Row-tile heuristic.

    * Single step for small M (launch overhead dominated).
    * Large tiles (up to 512) for big M: HBM streaming efficiency rises
      ~63% -> ~85% going 256 -> 512-wide tiles.
    * Keep >= 2 grid steps when M > 128 so the "parallel" axis shards across
      both v7x TensorCores; nudge toward an even grid when cheap.
    * Cap the tile so the double-buffered output block stays well inside the
      64 MiB v7x VMEM (weights/bias are small by comparison at bf16).
    """
    if M <= 128:
        return _round_up(max(M, 8), 8)
    budget = 40 << 20                          # bytes for 2x output block
    tm = 128
    for cand in (512, 256, 128):
        if 2 * cand * Vp * out_bytes > budget:
            continue
        if -(-M // cand) >= 2:
            tm = cand
            break
    if tm > 128 and (-(-M // tm)) % 2 == 1 and (-(-M // (tm // 2))) % 2 == 0:
        tm //= 2                                # even grid -> both v7x cores busy
    return tm


def ctc_head_softmax(x_btc, head_params, *, out_dtype=jnp.float32,
                     strip_padding=True, apply_softmax=True):
    """CTCHead eval path on pre-padded params.

    x_btc: (B, T, C) features. head_params: output of init_ctc_head_params.
    Returns (B, T, V) probs when strip_padding=True; otherwise the padded
    kernel output ((B, T, Vp) if no row padding was needed, else (Mp, Vp)) —
    padded vocab lanes are exact zeros, safe for argmax / CTC greedy decode.
    """
    B, T, C = x_btc.shape
    w_cv, b_1v, V = head_params["w_cv"], head_params["b_1v"], head_params["V"]
    assert w_cv.shape[0] == C, (w_cv.shape, C)
    Vp = w_cv.shape[1]

    M = B * T
    out_bytes = jnp.dtype(out_dtype).itemsize
    tm = _pick_row_tile(M, Vp, out_bytes)
    Mp = _round_up(M, tm)
    grid_m = Mp // tm

    # Flatten batch/time into one matmul M dim; cast activations to the
    # (bf16) compute dtype of the pre-padded weight.
    x2 = x_btc.reshape(M, C).astype(w_cv.dtype)
    if Mp != M:
        x2 = jnp.pad(x2, ((0, Mp - M), (0, 0)))

    kernel = functools.partial(_ctc_head_kernel, apply_softmax=apply_softmax)

    out_padded = pl.pallas_call(
        kernel,
        out_shape=jax.ShapeDtypeStruct((Mp, Vp), out_dtype),
        grid_spec=pltpu.PrefetchScalarGridSpec(
            num_scalar_prefetch=0,
            grid=(grid_m,),
            in_specs=[
                pl.BlockSpec((tm, C), lambda i: (i, 0)),
                pl.BlockSpec((C, Vp), lambda i: (0, 0)),
                pl.BlockSpec((1, Vp), lambda i: (0, 0)),
            ],
            out_specs=pl.BlockSpec((tm, Vp), lambda i: (i, 0)),
        ),
        compiler_params=pltpu.CompilerParams(
            dimension_semantics=("parallel",),
            vmem_limit_bytes=64 * 1024 * 1024,
        ),
    )(x2, w_cv, b_1v)

    if strip_padding:
        # Module-faithful (B, T, V) output; costs one extra HBM pass over probs.
        return out_padded[:M, :V].reshape(B, T, V)
    if Mp == M:
        return out_padded.reshape(B, T, Vp)
    return out_padded


def pp_ocrv3_rec_forward(feat_bchw, head_params, *, out_dtype=jnp.float32,
                         strip_padding=True, apply_softmax=True):
    """PP_OCRv3_Rec.forward from the backbone feature map onward (eval mode).

    feat_bchw: (B, C, 1, W) backbone output, NCHW.
    Returns (feats, probs) as CTCHead(return_feats=True) does in eval:
      feats: (B, W, C), probs: (B, W, V) softmaxed over V (default flags).
    """
    B, C, H, W = feat_bchw.shape
    assert H == 1, f"Height should be 1 after global average pooling, got {H}"
    # x.squeeze(2).permute(0, 2, 1) -> (B, W, C); this layout is also the
    # required return layout of `feats`, so it is computed once and reused.
    feats = jnp.transpose(feat_bchw[:, :, 0, :], (0, 2, 1))
    probs = ctc_head_softmax(feats, head_params, out_dtype=out_dtype,
                             strip_padding=strip_padding,
                             apply_softmax=apply_softmax)
    return feats, probs


if __name__ == "__main__":
    # Small shapes consistent with the module:
    #   backbone out_channels C=32 (head in_channels), out_char_num T=W=8,
    #   head out_channels V=37, batch B=2.
    B, C, W, V = 2, 32, 8, 37

    key = jax.random.PRNGKey(0)
    k_feat, k_w, k_b = jax.random.split(key, 3)

    # Deterministic synthetic backbone output (NCHW with H==1) and fc params.
    feat = jax.random.normal(k_feat, (B, C, 1, W), dtype=jnp.float32)
    fc_w = jax.random.normal(k_w, (V, C), dtype=jnp.float32) * 0.05  # torch (out, in)
    fc_b = jax.random.normal(k_b, (V,), dtype=jnp.float32) * 0.01

    # One-time param padding (model init), then run the forward.
    head_params = init_ctc_head_params(fc_w, fc_b)
    feats, probs = pp_ocrv3_rec_forward(feat, head_params)
    jax.block_until_ready(probs)

    # Reference check in plain JAX (f32).
    feats_ref = jnp.transpose(feat[:, :, 0, :], (0, 2, 1))
    logits_ref = jnp.einsum("btc,vc->btv", feats_ref, fc_w) + fc_b
    probs_ref = jax.nn.softmax(logits_ref, axis=2)

    assert probs.shape == (B, W, V)
    assert feats.shape == (B, W, C)
    # bf16 activations/weights + approx reciprocal: tolerance loosened vs f32.
    assert jnp.allclose(probs, probs_ref, atol=1e-2, rtol=1e-2)
    assert jnp.allclose(jnp.sum(probs, axis=-1), 1.0, atol=5e-3)

    print("KERNEL_OK")
</pallas_src>

<mosaic_0001>
module attributes {stable_mosaic.version = 11 : i64} {
  func.func @_ctc_head_kernel(%arg0: i32, %arg1: memref<16x32xbf16, #tpu.memory_space<vmem>>, %arg2: memref<32x128xbf16, #tpu.memory_space<vmem>>, %arg3: memref<1x128xf32, #tpu.memory_space<vmem>>, %arg4: memref<16x128xf32, #tpu.memory_space<vmem>>) attributes {dimension_semantics = [#tpu.dimension_semantics<parallel>], iteration_bounds = array<i64: 1>, scalar_prefetch = 0 : i64, scratch_operands = 0 : i64, tpu.core_type = #tpu.core_type<tc>, window_params = [{transform_indices = @transform_0, window_bounds = array<i64: 16, 32>}, {pipeline_mode = #tpu.pipeline_mode<synchronous>, transform_indices = @transform_1, window_bounds = array<i64: 32, 128>}, {pipeline_mode = #tpu.pipeline_mode<synchronous>, transform_indices = @transform_2, window_bounds = array<i64: 1, 128>}, {transform_indices = @transform_3, window_bounds = array<i64: 16, 128>}]} {
    %c0 = arith.constant 0 : index
    %c0_0 = arith.constant 0 : index
    %0 = vector.load %arg1[%c0, %c0_0] : memref<16x32xbf16, #tpu.memory_space<vmem>>, vector<16x32xbf16>
    %c0_1 = arith.constant 0 : index
    %c0_2 = arith.constant 0 : index
    %1 = vector.load %arg2[%c0_1, %c0_2] : memref<32x128xbf16, #tpu.memory_space<vmem>>, vector<32x128xbf16>
    %cst = arith.constant dense<0.000000e+00> : vector<16x128xf32>
    %2 = tpu.matmul %0, %1, %cst {dimension_numbers = #tpu.dot_dimension_numbers<[1], [0], [0], [1], [0, 0, 1, 1], [], []>} : vector<16x32xbf16>, vector<32x128xbf16>, vector<16x128xf32> -> vector<16x128xf32>
    %c0_3 = arith.constant 0 : index
    %c0_4 = arith.constant 0 : index
    %3 = vector.load %arg3[%c0_3, %c0_4] : memref<1x128xf32, #tpu.memory_space<vmem>>, vector<1x128xf32>
    %4 = vector.broadcast %3 : vector<1x128xf32> to vector<16x128xf32>
    %5 = arith.addf %2, %4 : vector<16x128xf32>
    %cst_5 = arith.constant dense<0xFF800000> : vector<16xf32>
    %6 = vector.multi_reduction <maximumf>, %5, %cst_5 [1] : vector<16x128xf32> to vector<16xf32>
    %7 = vector.shape_cast %6 : vector<16xf32> to vector<16x1xf32>
    %8 = vector.broadcast %7 : vector<16x1xf32> to vector<16x128xf32>
    %9 = arith.subf %5, %8 : vector<16x128xf32>
    %10 = math.exp %9 : vector<16x128xf32>
    %cst_6 = arith.constant dense<0.000000e+00> : vector<16xf32>
    %11 = vector.multi_reduction <add>, %10, %cst_6 [1] : vector<16x128xf32> to vector<16xf32>
    %12 = vector.shape_cast %11 : vector<16xf32> to vector<16x1xf32>
    %13 = tpu.reciprocal %12 {approx = true} : vector<16x1xf32> -> vector<16x1xf32>
    %14 = vector.broadcast %13 : vector<16x1xf32> to vector<16x128xf32>
    %15 = arith.mulf %10, %14 : vector<16x128xf32>
    %c0_7 = arith.constant 0 : index
    %c0_8 = arith.constant 0 : index
    %16 = vector.load %arg4[%c0_7, %c0_8] : memref<16x128xf32, #tpu.memory_space<vmem>>, vector<16x128xf32>
    tpu.vector_store %arg4[%c0_7, %c0_8], %15 {strides = array<i32>} : memref<16x128xf32, #tpu.memory_space<vmem>>, vector<16x128xf32>,
    return
  }
  func.func @transform_0(%arg0: i32) -> (i32, i32) {
    %c0_i32 = arith.constant 0 : i32
    %c0_i32_0 = arith.constant 0 : i32
    return %arg0, %c0_i32 : i32, i32
  }
  func.func @transform_1(%arg0: i32) -> (i32, i32) {
    %c0_i32 = arith.constant 0 : i32
    %c0_i32_0 = arith.constant 0 : i32
    %c0_i32_1 = arith.constant 0 : i32
    return %c0_i32, %c0_i32_0 : i32, i32
  }
  func.func @transform_2(%arg0: i32) -> (i32, i32) {
    %c0_i32 = arith.constant 0 : i32
    %c0_i32_0 = arith.constant 0 : i32
    %c0_i32_1 = arith.constant 0 : i32
    return %c0_i32, %c0_i32_0 : i32, i32
  }
  func.func @transform_3(%arg0: i32) -> (i32, i32) {
    %c0_i32 = arith.constant 0 : i32
    %c0_i32_0 = arith.constant 0 : i32
    return %arg0, %c0_i32 : i32, i32
  }
}

</mosaic_0001>

<bundles_post_ra>
// kernel: tpu_custom_call.1
= control target key start
LH: loop header
LB: loop body
LE: loop exit
PB: predicated region body
PF: predicated region fallthrough
CT: control target
= control target key end

     0   :  { %8 = vsyncpa [#allocation3], 0  ;;  %s384_s0 = inlined_call_operand.hbm [shape: bf16[16,32], index: 0, kind: input, shape index: {}]   ;;  %s385_s1 = inlined_call_operand.hbm [shape: bf16[32,128], index: 1, kind: input, shape index: {}]   ;;  %s386_s2 = inlined_call_operand.hbm [shape: f32[1,128], index: 2, kind: input, shape index: {}]   ;;  %s387_s3 = inlined_call_operand.hbm [shape: f32[16,128], index: 3, kind: output, shape index: {}]  }
   0x1   :  { %9 = vsyncpa [#allocation6], 0 }
   0x2   :  { %10 = vsyncpa [#allocation4], 0  ;;  %s299_s12 = smov [#allocation5]   ;;  %s300_s14 = smov [#allocation2]  }
   0x3   :  { %s28_s13 = sshll.u32 %s299_s12, 4  ;;  %s16_s15 = sshll.u32 %s300_s14, 4  ;;  %s29_s13 = int_to_ptr.vmem [resolvable:$true] %s28_s13  ;;  %s329_s15 = int_to_ptr.vmem [resolvable:$true] %s16_s15 }
   0x4   :  { %s205_s18 = scalar_lea.hbm %s385_s1, 256 }
   0x5   :  { %p206_p0 = scmp.ne.s32.totalorder %s385_s1, %s205_s18  ;;  %p209_p1 = scmp.lt.u32.totalorder %s205_s18, %s385_s1 }
   0x7   :  { %p211_p2 = pnand %p209_p1, %p206_p0 }
   0x9   :  { %214 = shalt.err (!%p211_p2)
}
   0xa   :  { %s215_s23 = scalar_lea.vmem %s29_s13, 256  ;;  %p220_p4 = scmp.lt.s32.totalorder %s29_s13, %s29_s13 }
   0xb   :  { %p216_p3 = scmp.ne.s32.totalorder %s29_s13, %s215_s23  ;;  %p221_p5 = scmp.lt.s32.totalorder %s215_s23, %s215_s23 }
   0xd   :  { %p222_p6 = por %p221_p5, %p220_p4 }
   0xf   :  { %p223_p7 = pnand %p222_p6, %p216_p3 }
  0x11   :  { %226 = shalt.err (!%p223_p7)
}
  0x12   :  { %s301_s24 = smov 64   ;;  %s302_s25 = smov 4  }
  0x13   :  { %34 = dma.hbm_to_vmem [thread:$0]  %s385_s1, 256, %s29_s13, [#allocation6], %s301_s24, %s301_s24, %s302_s25  }
  0x14   :  { %s227_s30 = scalar_lea.hbm %s384_s0, 128 }
  0x15   :  { %p228_p8 = scmp.ne.s32.totalorder %s384_s0, %s227_s30  ;;  %p231_p9 = scmp.lt.u32.totalorder %s227_s30, %s384_s0 }
  0x17   :  { %p233_p10 = pnand %p231_p9, %p228_p8 }
  0x19   :  { %236 = shalt.err (!%p233_p10)
}
  0x1a   :  { %s237_s8 = scalar_lea.vmem %s329_s15, 128  ;;  %p242_p12 = scmp.lt.s32.totalorder %s329_s15, %s329_s15 }
  0x1b   :  { %p238_p11 = scmp.ne.s32.totalorder %s329_s15, %s237_s8  ;;  %p243_p13 = scmp.lt.s32.totalorder %s237_s8, %s237_s8 }
  0x1d   :  { %p244_p0 = por %p243_p13, %p242_p12 }
  0x1f   :  { %p245_p1 = pnand %p244_p0, %p238_p11 }
  0x21   :  { %248 = shalt.err (!%p245_p1)
}
  0x22   :  { %22 = dma.hbm_to_vmem [thread:$0]  %s384_s0, 128, %s329_s15, [#allocation3], %s301_s24, %s301_s24, %s302_s25  }
  0x23   :  { %s303_s10 = smov [#allocation7]   ;;  %s249_s14 = scalar_lea.hbm %s386_s2, 16 }
  0x24   :  { %s41_s11 = sshll.u32 %s303_s10, 4  ;;  %p250_p2 = scmp.ne.s32.totalorder %s386_s2, %s249_s14  ;;  %s42_s11 = int_to_ptr.vmem [resolvable:$true] %s41_s11 }
  0x25   :  { %p253_p3 = scmp.lt.u32.totalorder %s249_s14, %s386_s2 }
  0x27   :  { %p255_p4 = pnand %p253_p3, %p250_p2 }
  0x29   :  { %258 = shalt.err (!%p255_p4)
}
  0x2a   :  { %s259_s20 = scalar_lea.vmem %s42_s11, 16  ;;  %s263_s0 = scalar_lea.vmem %s42_s11, 32 }
  0x2b   :  { %p260_p5 = scmp.ne.s32.totalorder %s42_s11, %s259_s20  ;;  %p264_p6 = scmp.lt.s32.totalorder %s42_s11, %s42_s11 }
  0x2c   :  { %p265_p7 = scmp.lt.s32.totalorder %s263_s0, %s259_s20 }
  0x2e   :  { %p266_p8 = por %p265_p7, %p264_p6 }
  0x30   :  { %p267_p9 = pnand %p266_p8, %p260_p5 }
  0x32   :  { %270 = shalt.err (!%p267_p9)
}
  0x33   :  { %44 = dma.hbm_to_vmem [thread:$0]  %s386_s2, 16, %s42_s11, [#allocation6]  }
  0x34   :  { %293 = dma.done.wait [#allocation3], 128  }
  0x35   :  { %294 = vsyncadd [#allocation3], 4294967168 }
  0x36   :  { %295 = dma.done.wait [#allocation6], 272  }
  0x37   :  { %296 = vsyncadd [#allocation6], 4294967024  ;;  %v304_v0 = vmov 0.0   ;;  %vm305_vm0 = vmmov 0   ;;  %v194_v1 = vld [vmem:[#allocation5] sm:$0xff]   ;;  %v195_v2 = vld [vmem:[#allocation5 + $0x8] sm:$0xff]  }
  0x38   :  { %176 = vmatprep.subr.bf16.mxu0 %v304_v0  ;;  %180 = vmatprep.mubr.msk.bf16.mxu0 %vm305_vm0, %v304_v0  ;;  %v196_v3 = vld [vmem:[#allocation2] sm:$0xff]   ;;  %vm85_vm1 = vcmask 261120   ;;  %v168_v4 = vld [vmem:[#allocation7] ss:$0 sm:$0xff]  ;;  %s306_s2 = smov [#allocation8]  }
  0x39   :  { %177 = vmatpush3.bf16.msra.mxu0 %v194_v1  ;;  %s155_s22 = sshll.u32 %s306_s2, 4  ;;  %s156_s22 = int_to_ptr.vmem [resolvable:$true] %s155_s22 }
  0x3a   :  { %178 = vmatprep.subr.bf16.mxu0 %v304_v0  ;;  %s271_s23 = scalar_lea.vmem %s156_s22, 256  ;;  %p276_p11 = scmp.lt.s32.totalorder %s156_s22, %s156_s22 }
  0x3b   :  { %p272_p10 = scmp.ne.s32.totalorder %s156_s22, %s271_s23  ;;  %p277_p12 = scmp.lt.s32.totalorder %s271_s23, %s271_s23 }
  0x3d   :  { %179 = vmatpush3.bf16.msra.mxu0 %v195_v2  ;;  %p278_p13 = por %p277_p12, %p276_p11 }
  0x3f   :  { %p279_p0 = pnand %p278_p13, %p272_p10 }
  0x40   :  { %181 = vmatmul.mubr.msk.bf16.vlgmr.msra.gmra.mrb[0].mxu0 %vm85_vm1, %v196_v3 }
 0x113   :  { %v123_v5 = vpop.f32.mrb[0].mxu0 }
 0x114   :  { %v124_v6 = vadd.f32 %v168_v4, %v123_v5  ;;  %v182_v7 = vpop.f32.mrb[1].mxu0 }
 0x115   :  { %v126_v8 = vpop.f32.mrb[2].mxu0 }
 0x116   :  { %130 = vmax.xlane.f32.xlu0 %v124_v6  ;;  %v183_v9 = vpop.f32.mrb[3].mxu0  ;;  %v127_v10 = vadd.f32 %v168_v4, %v126_v8 }
 0x11a   :  { %132 = vmax.xlane.f32.xlu0 %v127_v10 }
 0x1a3   :  { %v131_v11 = vpop.xlane.xlu0 %130 }
 0x1a4   :  { %v134_v12 = vsub.f32 %v124_v6, %v131_v11 }
 0x1a6   :  { %v136_v13 = vmul.f32 1.442695, %v134_v12 }
 0x1a7   :  { %v133_v14 = vpop.xlane.xlu0 %132 }
 0x1a8   :  { %197 = vpow2.f32 %v136_v13  ;;  %v135_v15 = vsub.f32 %v127_v10, %v133_v14 }
 0x1aa   :  { %v138_v16 = vmul.f32 1.442695, %v135_v15 }
 0x1ac   :  { %199 = vpow2.f32 %v138_v16 }
 0x1b2   :  { %v198_v17 = vpop.eup %197 }
 0x1b3   :  { %140 = vadd.xlane.f32.xlu1 %v198_v17 }
 0x1b6   :  { %v200_v18 = vpop.eup %199 }
 0x1b7   :  { %142 = vadd.xlane.f32.xlu1 %v200_v18 }
 0x240   :  { %v141_v19 = vpop.xlane.xlu1 %140 }
 0x241   :  { %201 = vrcp.f32 %v141_v19 }
 0x244   :  { %v143_v20 = vpop.xlane.xlu1 %142 }
 0x245   :  { %203 = vrcp.f32 %v143_v20 }
 0x24b   :  { %v202_v21 = vpop.eup %201 }
 0x24c   :  { %v146_v22 = vmul.f32 %v202_v21, %v198_v17 }
 0x24e   :  { %148 = vst [vmem:[#allocation8] sm:$0xff] %v146_v22 }
 0x24f   :  { %v204_v23 = vpop.eup %203 }
 0x250   :  { %v147_v24 = vmul.f32 %v204_v23, %v200_v18 }
 0x252   :  { %149 = vst [vmem:[#allocation8 + $0x8] sm:$0xff] %v147_v24 }
 0x253   :  { %282 = shalt.err (!%p279_p0)
}
 0x254   :  { %s283_s26 = scalar_lea.hbm %s387_s3, 256 }
 0x255   :  { %p284_p1 = scmp.ne.s32.totalorder %s387_s3, %s283_s26  ;;  %p287_p2 = scmp.lt.u32.totalorder %s283_s26, %s387_s3 }
 0x257   :  { %p289_p3 = pnand %p287_p2, %p284_p1 }
 0x259   :  { %292 = shalt.err (!%p289_p3)
}
 0x25a   :  { %s307_s4 = smov 128   ;;  %s308_s5 = smov 8  }
 0x25b   :  { %161 = dma.vmem_to_hbm [thread:$0]  %s156_s22, 256, %s387_s3, [#allocation4], %s307_s4, %s307_s4, %s308_s5  }
 0x25c   :  { %297 = dma.done.wait [#allocation4], 256  }
 0x25d   :  { %298 = vsyncadd [#allocation4], 4294967040 }
 0x25e   :  { %165 = vsyncpa [#allocation3], 1 }
 0x25f   :  { %166 = vsyncpa [#allocation6], 1 }
 0x260   :  { %167 = vsyncpa [#allocation4], 1 }

</bundles_post_ra>
